<compile_context>
chip_gen: v7x
topology: tpu7x:2x2x1
jax: 0.10.0
libtpu: 0.0.40
codegen_flags: <defaults>
</compile_context>

<pallas_src>
import functools
import math

import jax
import jax.numpy as jnp
from jax.experimental import pallas as pl
from jax.experimental.pallas import tpu as pltpu


# ----------------------------- Pallas kernel --------------------------------
def _conv3x3_kernel(xm_ref, xa_ref, xb_ref, w_ref, b_ref, o_ref, *,
                    relu: bool, r: int, mxu_dtype):
    """3x3 'same' conv on one row strip, with optional fused ReLU + PixelShuffle.

    xm_ref: (1, TILE_H, W+2, Cin)   padded input rows [s*TILE_H, (s+1)*TILE_H)
    xa_ref: (1, 1,      W+2, Cin)   halo row (s+1)*TILE_H
    xb_ref: (1, 1,      W+2, Cin)   halo row (s+1)*TILE_H + 1
    w_ref : (9*Cin, Cout)           taps flattened in (ky, kx, cin) order
                                    (output channels permuted to (i, j, c) if r>1)
    b_ref : (1, Cout)
    o_ref : (1, TILE_H, r, W*r, C)  phase-split output, C = Cout // r^2
    """
    tile_h = xm_ref.shape[1]
    wp2 = xm_ref.shape[2]
    cin = xm_ref.shape[3]
    wd = wp2 - 2
    cout = w_ref.shape[1]
    c = cout // (r * r)

    # Stitch the strip with its 2 halo rows (outer-dim concat, cheap).
    xs = jnp.concatenate([xm_ref[0], xa_ref[0], xb_ref[0]], axis=0)

    # im2col: one patch, one big-K MXU matmul.
    cols = []
    for ky in range(3):
        for kx in range(3):
            cols.append(xs[ky:ky + tile_h, kx:kx + wd, :])
    patch = jnp.concatenate(cols, axis=-1).reshape(tile_h * wd, 9 * cin)

    acc = jnp.dot(patch.astype(mxu_dtype), w_ref[...],
                  preferred_element_type=jnp.float32)
    acc = acc + b_ref[...]
    if relu:
        acc = jnp.maximum(acc, 0.0)

    # Fused PixelShuffle: channel layout is ((i*r + j)*C + c), so each row-phase i
    # is a contiguous lane slice and (TILE_H*W, r*C) -> (TILE_H, W*r, C) is a pure
    # row-major reshape. r == 1 degenerates to a plain store.
    rc = r * c
    for i in range(r):
        o_ref[0, :, i, :, :] = acc[:, i * rc:(i + 1) * rc].reshape(
            tile_h, wd * r, c).astype(o_ref.dtype)


# ------------------------------ wrapper --------------------------------------
def _pad_hw(x, value=None):
    """Pad H and W by 1 with zeros, or with a per-channel constant `value`."""
    n, h, w, ch = x.shape
    if value is None:
        return jnp.pad(x, ((0, 0), (1, 1), (1, 1), (0, 0)))
    full = jnp.broadcast_to(value.astype(x.dtype).reshape(1, 1, 1, ch),
                            (n, h + 2, w + 2, ch))
    return jax.lax.dynamic_update_slice(full, x, (0, 1, 1, 0))


def _pick_tile_h(h, w, cin, cout, budget_bytes=8 * 1024 * 1024):
    """Largest divisor of H whose per-step f32 working set fits the budget."""
    def footprint(t):
        strip = (t + 2) * (w + 2) * cin * 4
        patch = t * w * 9 * cin * 4
        outb = 2 * t * w * cout * 4
        return strip + patch + outb

    cap = h if h < 16 else max(2, h // 2)   # >=2 strips when H is big enough
    best = 1
    for t in range(1, cap + 1):
        if h % t == 0 and footprint(t) <= budget_bytes:
            best = t
    return best


def conv3x3_pallas(x, w, b, *, relu=False, shuffle_r=1, pad_value=None,
                   mxu_dtype=jnp.float32):
    """3x3 conv, stride 1, pad 1 (PyTorch default_conv), NHWC.

    shuffle_r > 1 additionally fuses a PixelShuffle(r) into the writeback.
    Returns the (optionally upsampled) NHWC activation in float32.
    """
    n, h, w_dim, cin = x.shape
    cout = w.shape[-1]
    r = shuffle_r
    c_out_final = cout // (r * r)

    if r > 1:
        # permute output channels c*r*r + i*r + j  ->  (i*r + j)*C + c
        perm = (jnp.arange(c_out_final)[None, :] * (r * r)
                + jnp.arange(r * r)[:, None]).reshape(-1)
        w = w[..., perm]
        b = b[perm]

    x_pad = _pad_hw(x, pad_value)
    w9 = w.reshape(9 * cin, cout).astype(mxu_dtype)
    b2 = b.reshape(1, cout).astype(jnp.float32)

    tile_h = _pick_tile_h(h, w_dim, cin, cout)
    n_strips = h // tile_h

    kernel = functools.partial(_conv3x3_kernel, relu=relu, r=r,
                               mxu_dtype=mxu_dtype)

    out5 = pl.pallas_call(
        kernel,
        out_shape=jax.ShapeDtypeStruct((n, h, r, w_dim * r, c_out_final),
                                       jnp.float32),
        grid_spec=pltpu.PrefetchScalarGridSpec(
            num_scalar_prefetch=0,
            grid=(n, n_strips),
            in_specs=[
                pl.BlockSpec((1, tile_h, w_dim + 2, cin),
                             lambda ni, si: (ni, si, 0, 0)),
                pl.BlockSpec((1, 1, w_dim + 2, cin),
                             lambda ni, si: (ni, (si + 1) * tile_h, 0, 0)),
                pl.BlockSpec((1, 1, w_dim + 2, cin),
                             lambda ni, si: (ni, (si + 1) * tile_h + 1, 0, 0)),
                pl.BlockSpec((9 * cin, cout), lambda ni, si: (0, 0)),
                pl.BlockSpec((1, cout), lambda ni, si: (0, 0)),
            ],
            out_specs=pl.BlockSpec((1, tile_h, r, w_dim * r, c_out_final),
                                   lambda ni, si: (ni, si, 0, 0, 0)),
        ),
        compiler_params=pltpu.CompilerParams(
            dimension_semantics=("parallel", "parallel"),
            vmem_limit_bytes=32 * 1024 * 1024),
    )(x_pad, x_pad, x_pad, w9, b2)

    # Free row-major merge of (H, r) -> H*r : the actual upsampled image.
    return out5.reshape(n, h * r, w_dim * r, c_out_final)


# ------------------------------ model glue ------------------------------------
def _kaiming_normal(key, kh, kw, cin, cout):
    std = math.sqrt(2.0 / (cin * kh * kw))
    return jax.random.normal(key, (kh, kw, cin, cout), jnp.float32) * std


def init_sisr_params(key, num_features=32, scale=2, n_colors=3):
    ks = jax.random.split(key, 8)
    params = {}
    params["w_in"] = _kaiming_normal(ks[0], 3, 3, 3, num_features)
    params["b_in"] = jnp.zeros((num_features,), jnp.float32)

    up = []
    if scale in (2, 4, 8):
        n_stages = int(math.log2(scale))
        for s in range(n_stages):
            w = _kaiming_normal(ks[1 + s], 3, 3, num_features, 4 * num_features)
            up.append((w, jnp.zeros((4 * num_features,), jnp.float32), 2))
    elif scale == 3:
        w = _kaiming_normal(ks[1], 3, 3, num_features, 9 * num_features)
        up.append((w, jnp.zeros((9 * num_features,), jnp.float32), 3))
    else:
        raise ValueError("unsupported scale")
    params["up"] = up

    params["w_out"] = _kaiming_normal(ks[6], 3, 3, num_features, n_colors)
    params["b_out"] = jnp.zeros((n_colors,), jnp.float32)
    return params


def sisr_forward(x_nchw, params, rgb_range=255.0, mxu_dtype=jnp.float32):
    rgb_mean = jnp.array([0.4488, 0.4371, 0.4040], jnp.float32) * rgb_range

    x = jnp.transpose(x_nchw, (0, 2, 3, 1)).astype(jnp.float32)  # NCHW -> NHWC

    # sub_mean folded into the input conv: pad with the mean and subtract
    # sum_taps(W . mean) from the bias  (exact, including the border).
    b_in = params["b_in"] - jnp.einsum("hwio,i->o", params["w_in"], rgb_mean)
    x = conv3x3_pallas(x, params["w_in"], b_in, relu=False,
                       pad_value=rgb_mean, mxu_dtype=mxu_dtype)

    for (w, b, r) in params["up"]:                     # conv + ReLU + PixelShuffle
        x = conv3x3_pallas(x, w, b, relu=True, shuffle_r=r, mxu_dtype=mxu_dtype)

    b_out = params["b_out"] + rgb_mean                 # add_mean folded into bias
    x = conv3x3_pallas(x, params["w_out"], b_out, relu=False, mxu_dtype=mxu_dtype)

    return jnp.transpose(x, (0, 3, 1, 2))              # NHWC -> NCHW


# --------------------------- reference (pure JAX) -----------------------------
def pixel_shuffle_nhwc(x, r):
    # out[n, h*r+i, w*r+j, c] == in[n, h, w, c*r*r + i*r + j]  (PyTorch order)
    n, h, w, crr = x.shape
    c = crr // (r * r)
    x = x.reshape(n, h, w, c, r, r)
    x = x.transpose(0, 1, 4, 2, 5, 3)
    return x.reshape(n, h * r, w * r, c)


def _conv3x3_ref(x_nhwc, w, b, relu=False):
    out = jax.lax.conv_general_dilated(
        x_nhwc, w, window_strides=(1, 1), padding="SAME",
        dimension_numbers=("NHWC", "HWIO", "NHWC"))
    out = out + b
    return jnp.maximum(out, 0.0) if relu else out


def sisr_forward_ref(x_nchw, params, rgb_range=255.0):
    rgb_mean = jnp.array([0.4488, 0.4371, 0.4040], jnp.float32) * rgb_range
    x = jnp.transpose(x_nchw, (0, 2, 3, 1))
    x = x - rgb_mean
    x = _conv3x3_ref(x, params["w_in"], params["b_in"])
    for (w, b, r) in params["up"]:
        x = _conv3x3_ref(x, w, b, relu=True)
        x = pixel_shuffle_nhwc(x, r)
    x = _conv3x3_ref(x, params["w_out"], params["b_out"])
    x = x + rgb_mean
    return jnp.transpose(x, (0, 3, 1, 2))


# --------------------------------- main ---------------------------------------
if __name__ == "__main__":
    key = jax.random.PRNGKey(0)
    k_x, k_p = jax.random.split(key)

    N, C, H, W = 2, 3, 16, 16
    num_features, scale, rgb_range = 32, 2, 255.0

    x = jax.random.uniform(k_x, (N, C, H, W), jnp.float32) * rgb_range
    params = init_sisr_params(k_p, num_features=num_features, scale=scale,
                              n_colors=3)

    ref = jax.block_until_ready(sisr_forward_ref(x, params, rgb_range=rgb_range))

    # f32 path: exact parity with the reference forward pass.
    out = jax.block_until_ready(sisr_forward(x, params, rgb_range=rgb_range))
    assert out.shape == (N, 3, H * scale, W * scale), out.shape
    assert jnp.allclose(out, ref, rtol=1e-2, atol=1e-1), float(
        jnp.max(jnp.abs(out - ref)))

    # bf16-fed MXU path (v6e/v7x guidance), f32 accumulation; looser tolerance
    # against the f32 reference.
    out_bf16 = jax.block_until_ready(
        sisr_forward(x, params, rgb_range=rgb_range, mxu_dtype=jnp.bfloat16))
    assert jnp.allclose(out_bf16, ref, rtol=5e-2, atol=5.0), float(
        jnp.max(jnp.abs(out_bf16 - ref)))

    print("KERNEL_OK")
</pallas_src>

<mosaic_0001>
module attributes {stable_mosaic.version = 11 : i64} {
  func.func @_conv3x3_kernel(%arg0: i32, %arg1: i32, %arg2: memref<1x8x18x3xf32, #tpu.memory_space<vmem>>, %arg3: memref<1x1x18x3xf32, #tpu.memory_space<vmem>>, %arg4: memref<1x1x18x3xf32, #tpu.memory_space<vmem>>, %arg5: memref<27x32xf32, #tpu.memory_space<vmem>>, %arg6: memref<1x32xf32, #tpu.memory_space<vmem>>, %arg7: memref<1x8x1x16x32xf32, #tpu.memory_space<vmem>>) attributes {dimension_semantics = [#tpu.dimension_semantics<parallel>, #tpu.dimension_semantics<parallel>], iteration_bounds = array<i64: 2, 2>, scalar_prefetch = 0 : i64, scratch_operands = 0 : i64, tpu.core_type = #tpu.core_type<tc>, window_params = [{transform_indices = @transform_0, window_bounds = array<i64: 1, 8, 18, 3>}, {transform_indices = @transform_1, window_bounds = array<i64: 1, 1, 18, 3>}, {transform_indices = @transform_2, window_bounds = array<i64: 1, 1, 18, 3>}, {pipeline_mode = #tpu.pipeline_mode<synchronous>, transform_indices = @transform_3, window_bounds = array<i64: 27, 32>}, {pipeline_mode = #tpu.pipeline_mode<synchronous>, transform_indices = @transform_4, window_bounds = array<i64: 1, 32>}, {transform_indices = @transform_5, window_bounds = array<i64: 1, 8, 1, 16, 32>}]} {
    %c0 = arith.constant 0 : index
    %c0_0 = arith.constant 0 : index
    %c0_1 = arith.constant 0 : index
    %c0_2 = arith.constant 0 : index
    %0 = vector.load %arg2[%c0, %c0_0, %c0_1, %c0_2] : memref<1x8x18x3xf32, #tpu.memory_space<vmem>>, vector<1x8x18x3xf32>
    %1 = vector.shape_cast %0 : vector<1x8x18x3xf32> to vector<8x18x3xf32>
    %c0_3 = arith.constant 0 : index
    %c0_4 = arith.constant 0 : index
    %c0_5 = arith.constant 0 : index
    %c0_6 = arith.constant 0 : index
    %2 = vector.load %arg3[%c0_3, %c0_4, %c0_5, %c0_6] : memref<1x1x18x3xf32, #tpu.memory_space<vmem>>, vector<1x1x18x3xf32>
    %3 = vector.shape_cast %2 : vector<1x1x18x3xf32> to vector<1x18x3xf32>
    %c0_7 = arith.constant 0 : index
    %c0_8 = arith.constant 0 : index
    %c0_9 = arith.constant 0 : index
    %c0_10 = arith.constant 0 : index
    %4 = vector.load %arg4[%c0_7, %c0_8, %c0_9, %c0_10] : memref<1x1x18x3xf32, #tpu.memory_space<vmem>>, vector<1x1x18x3xf32>
    %5 = vector.shape_cast %4 : vector<1x1x18x3xf32> to vector<1x18x3xf32>
    %6 = tpu.concatenate %1, %3, %5 in 0 : vector<8x18x3xf32>, vector<1x18x3xf32>, vector<1x18x3xf32> -> vector<10x18x3xf32>
    %7 = vector.extract_strided_slice %6 {offsets = [0, 0, 0], sizes = [8, 16, 3], strides = [1, 1, 1]} : vector<10x18x3xf32> to vector<8x16x3xf32>
    %8 = vector.extract_strided_slice %6 {offsets = [0, 1, 0], sizes = [8, 16, 3], strides = [1, 1, 1]} : vector<10x18x3xf32> to vector<8x16x3xf32>
    %9 = vector.extract_strided_slice %6 {offsets = [0, 2, 0], sizes = [8, 16, 3], strides = [1, 1, 1]} : vector<10x18x3xf32> to vector<8x16x3xf32>
    %10 = vector.extract_strided_slice %6 {offsets = [1, 0, 0], sizes = [8, 16, 3], strides = [1, 1, 1]} : vector<10x18x3xf32> to vector<8x16x3xf32>
    %11 = vector.extract_strided_slice %6 {offsets = [1, 1, 0], sizes = [8, 16, 3], strides = [1, 1, 1]} : vector<10x18x3xf32> to vector<8x16x3xf32>
    %12 = vector.extract_strided_slice %6 {offsets = [1, 2, 0], sizes = [8, 16, 3], strides = [1, 1, 1]} : vector<10x18x3xf32> to vector<8x16x3xf32>
    %13 = vector.extract_strided_slice %6 {offsets = [2, 0, 0], sizes = [8, 16, 3], strides = [1, 1, 1]} : vector<10x18x3xf32> to vector<8x16x3xf32>
    %14 = vector.extract_strided_slice %6 {offsets = [2, 1, 0], sizes = [8, 16, 3], strides = [1, 1, 1]} : vector<10x18x3xf32> to vector<8x16x3xf32>
    %15 = vector.extract_strided_slice %6 {offsets = [2, 2, 0], sizes = [8, 16, 3], strides = [1, 1, 1]} : vector<10x18x3xf32> to vector<8x16x3xf32>
    %16 = tpu.concatenate %7, %8, %9, %10, %11, %12, %13, %14, %15 in 2 : vector<8x16x3xf32>, vector<8x16x3xf32>, vector<8x16x3xf32>, vector<8x16x3xf32>, vector<8x16x3xf32>, vector<8x16x3xf32>, vector<8x16x3xf32>, vector<8x16x3xf32>, vector<8x16x3xf32> -> vector<8x16x27xf32>
    %17 = vector.shape_cast %16 : vector<8x16x27xf32> to vector<128x27xf32>
    %c0_11 = arith.constant 0 : index
    %c0_12 = arith.constant 0 : index
    %18 = vector.load %arg5[%c0_11, %c0_12] : memref<27x32xf32, #tpu.memory_space<vmem>>, vector<27x32xf32>
    %cst = arith.constant dense<0.000000e+00> : vector<128x32xf32>
    %19 = tpu.matmul %17, %18, %cst {dimension_numbers = #tpu.dot_dimension_numbers<[1], [0], [0], [1], [0, 0, 1, 1], [], []>} : vector<128x27xf32>, vector<27x32xf32>, vector<128x32xf32> -> vector<128x32xf32>
    %c0_13 = arith.constant 0 : index
    %c0_14 = arith.constant 0 : index
    %20 = vector.load %arg6[%c0_13, %c0_14] : memref<1x32xf32, #tpu.memory_space<vmem>>, vector<1x32xf32>
    %21 = vector.broadcast %20 : vector<1x32xf32> to vector<128x32xf32>
    %22 = arith.addf %19, %21 : vector<128x32xf32>
    %23 = vector.shape_cast %22 : vector<128x32xf32> to vector<8x16x32xf32>
    %c0_15 = arith.constant 0 : index
    %c0_16 = arith.constant 0 : index
    %c0_17 = arith.constant 0 : index
    %c0_18 = arith.constant 0 : index
    %c0_19 = arith.constant 0 : index
    %24 = vector.load %arg7[%c0_15, %c0_16, %c0_17, %c0_18, %c0_19] : memref<1x8x1x16x32xf32, #tpu.memory_space<vmem>>, vector<1x8x1x16x32xf32>
    %25 = vector.shape_cast %24 : vector<1x8x1x16x32xf32> to vector<8x16x32xf32>
    %26 = vector.shape_cast %23 : vector<8x16x32xf32> to vector<1x8x1x16x32xf32>
    tpu.vector_store %arg7[%c0_15, %c0_16, %c0_17, %c0_18, %c0_19], %26 {strides = array<i32>} : memref<1x8x1x16x32xf32, #tpu.memory_space<vmem>>, vector<1x8x1x16x32xf32>,
    return
  }
  func.func @transform_0(%arg0: i32, %arg1: i32) -> (i32, i32, i32, i32) {
    %c0_i32 = arith.constant 0 : i32
    %c0_i32_0 = arith.constant 0 : i32
    %c0_i32_1 = arith.constant 0 : i32
    return %arg0, %arg1, %c0_i32, %c0_i32_0 : i32, i32, i32, i32
  }
  func.func @transform_1(%arg0: i32, %arg1: i32) -> (i32, i32, i32, i32) {
    %c1_i32 = arith.constant 1 : i32
    %0 = arith.addi %arg1, %c1_i32 : i32
    %c8_i32 = arith.constant 8 : i32
    %1 = arith.muli %0, %c8_i32 : i32
    %c0_i32 = arith.constant 0 : i32
    %c0_i32_0 = arith.constant 0 : i32
    %c0_i32_1 = arith.constant 0 : i32
    return %arg0, %1, %c0_i32, %c0_i32_0 : i32, i32, i32, i32
  }
  func.func @transform_2(%arg0: i32, %arg1: i32) -> (i32, i32, i32, i32) {
    %c1_i32 = arith.constant 1 : i32
    %0 = arith.addi %arg1, %c1_i32 : i32
    %c8_i32 = arith.constant 8 : i32
    %1 = arith.muli %0, %c8_i32 : i32
    %c1_i32_0 = arith.constant 1 : i32
    %2 = arith.addi %1, %c1_i32_0 : i32
    %c0_i32 = arith.constant 0 : i32
    %c0_i32_1 = arith.constant 0 : i32
    %c0_i32_2 = arith.constant 0 : i32
    return %arg0, %2, %c0_i32, %c0_i32_1 : i32, i32, i32, i32
  }
  func.func @transform_3(%arg0: i32, %arg1: i32) -> (i32, i32) {
    %c0_i32 = arith.constant 0 : i32
    %c0_i32_0 = arith.constant 0 : i32
    %c0_i32_1 = arith.constant 0 : i32
    return %c0_i32, %c0_i32_0 : i32, i32
  }
  func.func @transform_4(%arg0: i32, %arg1: i32) -> (i32, i32) {
    %c0_i32 = arith.constant 0 : i32
    %c0_i32_0 = arith.constant 0 : i32
    %c0_i32_1 = arith.constant 0 : i32
    return %c0_i32, %c0_i32_0 : i32, i32
  }
  func.func @transform_5(%arg0: i32, %arg1: i32) -> (i32, i32, i32, i32, i32) {
    %c0_i32 = arith.constant 0 : i32
    %c0_i32_0 = arith.constant 0 : i32
    %c0_i32_1 = arith.constant 0 : i32
    %c0_i32_2 = arith.constant 0 : i32
    return %arg0, %arg1, %c0_i32, %c0_i32_0, %c0_i32_1 : i32, i32, i32, i32, i32
  }
}

</mosaic_0001>

<bundles_post_ra>
// kernel: tpu_custom_call.1
= control target key start
LH: loop header
LB: loop body
LE: loop exit
PB: predicated region body
PF: predicated region fallthrough
CT: control target
= control target key end

     0   :  { %s2644_s0 = inlined_call_operand.vmem [shape: f32[2,18,18,3], index: 0, kind: input, shape index: {}]   ;;  %s2645_s1 = inlined_call_operand.vmem [shape: f32[2,18,18,3], index: 1, kind: input, shape index: {}]   ;;  %s2646_s2 = inlined_call_operand.vmem [shape: f32[2,18,18,3], index: 2, kind: input, shape index: {}]   ;;  %s2647_s3 = inlined_call_operand.vmem [shape: f32[27,32], index: 3, kind: input, shape index: {}]   ;;  %s2648_s4 = inlined_call_operand.vmem [shape: f32[1,32], index: 4, kind: input, shape index: {}]   ;;  %s2649_s5 = inlined_call_operand.hbm [shape: f32[2,16,1,16,32], index: 5, kind: output, shape index: {}]  }
   0x1   :  { %2673 = sst [smem:[#allocation14_spill]] %s2644_s0 }
   0x2   :  { %10 = vsyncpa [#allocation3], 0 }
   0x3   :  { %12 = vsyncpa [#allocation3 + $0x1], 0  ;;  %s1781_s18 = smov 0   ;;  %s1783_s19 = smov 0  }
   0x4   :  { %s1785_s20 = smov 0   ;;  %s1787_s21 = smov 0  }
   0x5   :  { %s1789_s22 = smov 0   ;;  %s1791_s23 = smov 0  }
   0x6   :  { %s1793_s24 = smov 0   ;;  %s1795_s25 = smov 0  }
   0x7 LB: > { %s1437_s26 = sadd.s32 4294967295, %s1737_s25   ;;  %s1438_s27 = sadd.s32 4294967294, %s1737_s25   ;;  %s1737_s25 = sphi %s1795_s25, %s18_s25   ;;  %s1733_s24 = sphi %s1793_s24, %s2709_s24   ;;  %s1729_s23 = sphi %s1791_s23, %s2708_s23   ;;  %s1725_s22 = sphi %s1789_s22, %s2707_s22   ;;  %s1721_s21 = sphi %s1787_s21, %s2706_s21   ;;  %s1717_s20 = sphi %s1785_s20, %s2705_s20   ;;  %s1713_s19 = sphi %s1783_s19, %s2704_s19   ;;  %s1709_s18 = sphi %s1781_s18, %s2703_s18  }
   0x8   : > { %s27_s28 = sadd.s32 1, %s1729_s23  ;;  %s30_s29 = sadd.s32 1, %s1733_s24 }
   0x9   : > { %p28_p0 = scmp.ge.s32.totalorder %s27_s28, 2  ;;  %p185_p1 = scmp.ne.s32.totalorder %s1717_s20, %s1713_s19 }
   0xa   : > { %p186_p2 = scmp.eq.s32.totalorder %s1437_s26, 3  ;;  %p191_p5 = scmp.ne.s32.totalorder %s1713_s19, %s1709_s18 }
   0xb   : > { %s2711_s28 = smov (%p28_p0, %s27_s28), 0  ;;  %s2713_s29 = smov (!%p28_p0, %s30_s29), %s1733_s24 }
   0xc   : > { %s171_s30 = ssub.s32 %s1729_s23, %s2711_s28  ;;  %p1832_p3 = por %p186_p2, %p185_p1 }
   0xd   : > { %p32_p4 = scmp.ge.s32.totalorder %s2713_s29, 2  ;;  %p192_p6 = scmp.eq.s32.totalorder %s1438_s27, 3 }
   0xe   : > { %p1445_p7 = scmp.ge.s32.totalorder %s1737_s25, 1  ;;  %p274_p9 = scmp.lt.s32.totalorder %s1737_s25, 5 }
   0xf   : > { %s2715_s29 = smov (%p32_p4, %s2713_s29), 0  ;;  %p1841_p8 = por %p192_p6, %p191_p5 }
  0x10   : > { %s170_s8 = ssub.s32 %s1733_s24, %s2715_s29  ;;  %s175_s9 = sadd.s32 1, %s1717_s20 }
  0x11   : > { %s172_s10 = sor.u32 %s171_s30, %s170_s8  ;;  %p275_p10 = pnand %p1445_p7, %p274_p9 }
  0x12   : > { %p173_p11 = scmp.eq.s32.totalorder %s172_s10, 0 }
  0x13   : > { %278 = sbr.rel (%p275_p10) target bundleno = 639 (0x27f), region = 40 }
  0x14   : > { %s1850_s11 = scalar_select %p173_p11, %s1717_s20, %s175_s9  }
  0x1a   : > { %s1853_s12 = sshll.u32 %s1721_s21, 3  ;;  %p341_p12 = scmp.lt.s32.totalorder %s1725_s22, 1  ;;  %vm439_vm0 = vcmask 1046528   ;;  %vm528_vm1 = vcmask 1045504   ;;  %vm1127_vm2 = vcmask 1042432   ;;  %vm1747_vm3 = vmmov 1  }
  0x1b   : > { %p343_p13 = scmp.lt.s32.totalorder %s1853_s12, 17  ;;  %s2676_s0 = sld [smem:[#allocation14_spill]]  ;;  %vm1548_vm4 = vmpackc.low %vm1127_vm2, %vm1747_vm3  ;;  %vm931_vm5 = vcmask 23552   ;;  %vm948_vm6 = vcmask 48128   ;;  %vm965_vm7 = vcmask 72704   ;;  %vm982_vm8 = vcmask 97280  }
  0x1c   : > { %s342_s13 = scalar_select %p341_p12, %s1725_s22, 1  ;;  %vm999_vm9 = vcmask 121856   ;;  %vm1016_vm10 = vcmask 146432   ;;  %vm1033_vm11 = vcmask 171008   ;;  %vm1050_vm12 = vcmask 195584  }
  0x1d   : > { %s344_s14 = scalar_select %p343_p13, %s1853_s12, 17  ;;  %vm1078_vm13 = vcmask 220160   ;;  %vm1276_vm14 = vcmask 261120  }
  0x1e   : > { %s1859_s15 = smul.u32 54, %s342_s13  ;;  %s1739_s9 = smov 3  }
  0x1f   : > { %s1557_s16 = smul.u32 3, %s344_s14  ;;  %s2654_s10 = smov 6  }
  0x20   : > { %s2650_s13 = smov 9   ;;  %s2656_s14 = smov 12  }
  0x21   : > { %s347_s17 = sadd.s32 %s1859_s15, %s1557_s16  ;;  %s2662_s16 = smov 15  }
  0x22   : > { %s1448_s26 = sshll.u32 %s347_s17, 3  ;;  %s2652_s17 = smov 18  }
  0x23   : > { %s1865_s8 = scalar_lea.vmem %s2676_s0, %s1448_s26  ;;  %s2658_s26 = smov 21  }
  0x24   : > { %v1868_v0 = vld [vmem:[%s1865_s8 + $0x8] sm:$0xff]  ;;  %v387_v1 = vld [vmem:[%s1865_s8 + $0x10] sm:$0x3]  ;;  %v1872_v2 = vld [vmem:[%s1865_s8] sm:$0xff]  ;;  %s2685_s27 = smov 18   ;;  %s2688_s30 = smov 9  }
  0x25   : > { %v441_v3 = vrot.slane %v1868_v0, 1  ;;  %v443_v4 = vrot.slane %v387_v1, 1  ;;  %v440_v5 = vrot.slane %v1872_v2, 1  ;;  %v1877_v6 = vld [vmem:[%s1865_s8 + $0x68] sm:$0xff]  ;;  %v399_v7 = vld [vmem:[%s1865_s8 + $0x70] sm:$0x3] }
  0x26   : > { %v461_v8 = vrot.slane %v1877_v6, 1  ;;  %v463_v9 = vrot.slane %v399_v7, 1  ;;  %v1882_v10 = vld [vmem:[%s1865_s8 + $0x60] sm:$0xff]  ;;  %v550_v14 = vrot.slane %v1877_v6, 2  ;;  %v529_v15 = vrot.slane %v1872_v2, 2  ;;  %v1918_v26 = vld [vmem:[%s1865_s8 + $0x78] sm:$0xff] }
  0x27   : > { %v444_v11 = vsel %vm439_vm0, %v441_v3, %v443_v4  ;;  %v442_v12 = vsel %vm439_vm0, %v440_v5, %v441_v3  ;;  %v460_v13 = vrot.slane %v1882_v10, 1  ;;  %v549_v18 = vrot.slane %v1882_v10, 2  ;;  %v1921_v27 = vld [vmem:[%s1865_s8 + $0x18] sm:$0xff]  ;;  %v1924_v28 = vld [vmem:[%s1865_s8 + $0x80] sm:$0xff]  ;;  %v402_v36 = vld [vmem:[%s1865_s8 + $0x88] sm:$0x3] }
  0x28   : > { %482 = vrot.lane.b32.xlu1 %v444_v11, %s1739_s9  ;;  %480 = vrot.lane.b32.xlu0 %v442_v12, %s1739_s9  ;;  %v1892_v16 = vsel %vm439_vm0, %v461_v8, %v463_v9  ;;  %v530_v19 = vrot.slane %v1868_v0, 2  ;;  %v552_v22 = vrot.slane %v399_v7, 2  ;;  %v532_v23 = vrot.slane %v387_v1, 2  ;;  %v1927_v29 = vld [vmem:[%s1865_s8 + $0x20] sm:$0xff]  ;;  %v390_v37 = vld [vmem:[%s1865_s8 + $0x28] sm:$0x3] }
  0x29   : > { %v1895_v17 = vsel %vm439_vm0, %v460_v13, %v461_v8  ;;  %v1904_v20 = vsel %vm528_vm1, %v549_v18, %v550_v14  ;;  %v465_v30 = vrot.slane %v1918_v26, 1  ;;  %v466_v31 = vrot.slane %v1924_v28, 1  ;;  %v1985_v52 = vld [vmem:[%s1865_s8 + $0x90] sm:$0xff]  ;;  %v1998_v54 = vld [vmem:[%s1865_s8 + $0x98] sm:$0xff]  ;;  %v405_v62 = vld [vmem:[%s1865_s8 + $0xa0] sm:$0x3] }
  0x2a   : > { %v531_v21 = vsel %vm528_vm1, %v529_v15, %v530_v19  ;;  %v1911_v24 = vsel %vm528_vm1, %v550_v14, %v552_v22  ;;  %v533_v25 = vsel %vm528_vm1, %v530_v19, %v532_v23  ;;  %v445_v32 = vrot.slane %v1921_v27, 1  ;;  %v1988_v53 = vld [vmem:[%s1865_s8 + $0x30] sm:$0xff]  ;;  %v2001_v55 = vld [vmem:[%s1865_s8 + $0x38] sm:$0xff]  ;;  %v393_v63 = vld [vmem:[%s1865_s8 + $0x40] sm:$0x3]  ;;  %s2689_s0 = smov 15  }
  0x2b   : > { %v446_v33 = vrot.slane %v1927_v29, 1  ;;  %v1942_v34 = vsel %vm439_vm0, %v465_v30, %v466_v31  ;;  %v468_v38 = vrot.slane %v402_v36, 1  ;;  %v448_v39 = vrot.slane %v390_v37, 1  ;;  %2681 = vst [vmem:[#allocation9_spill] sm:$0xff] %v2001_v55  ;;  %v1067_v12 = vld [vmem:[%s2647_s3] sm:$0xff]  ;;  %v1068_v13 = vld [vmem:[%s2647_s3 + $0x8] sm:$0xff] }
  0x2c   : > { %498 = vrot.lane.b32.xlu1 %v1892_v16, %s1739_s9  ;;  %496 = vrot.lane.b32.xlu0 %v1895_v17, %s1739_s9  ;;  %2677 = vst [vmem:[#allocation5_spill] sm:$0xff] %v1942_v34  ;;  %v554_v40 = vrot.slane %v1918_v26, 2  ;;  %v555_v41 = vrot.slane %v1924_v28, 2  ;;  %v534_v44 = vrot.slane %v1921_v27, 2  ;;  %v535_v45 = vrot.slane %v1927_v29, 2  ;;  %v1069_v19 = vld [vmem:[%s2647_s3 + $0x10] sm:$0xff] }
  0x2d   : > { %v447_v35 = vsel %vm439_vm0, %v445_v32, %v446_v33  ;;  %v1956_v42 = vsel %vm439_vm0, %v466_v31, %v468_v38  ;;  %v449_v43 = vsel %vm439_vm0, %v446_v33, %v448_v39  ;;  %v557_v48 = vrot.slane %v402_v36, 2  ;;  %v2068_v32 = vld [vmem:[%s1865_s8 + $0xa8] sm:$0xff] }
  0x2e   : > { %2678 = vst [vmem:[#allocation6_spill] sm:$0xff] %v1956_v42  ;;  %v1965_v46 = vsel %vm528_vm1, %v554_v40, %v555_v41  ;;  %v536_v47 = vsel %vm528_vm1, %v534_v44, %v535_v45  ;;  %v537_v49 = vrot.slane %v390_v37, 2  ;;  %v470_v56 = vrot.slane %v1985_v52, 1  ;;  %2683 = vst [vmem:[#allocation10_spill] sm:$0xff] %v2068_v32  ;;  %v2071_v33 = vld [vmem:[%s1865_s8 + $0x48] sm:$0xff] }
  0x2f   : > { %2679 = vst [vmem:[#allocation7_spill] sm:$0xff] %v1965_v46  ;;  %v1978_v50 = vsel %vm528_vm1, %v555_v41, %v557_v48  ;;  %v471_v57 = vrot.slane %v1998_v54, 1  ;;  %v450_v58 = vrot.slane %v1988_v53, 1  ;;  %v451_v59 = vrot.slane %v2001_v55, 1  ;;  %2684 = vst [vmem:[#allocation11_spill] sm:$0xff] %v2071_v33  ;;  %v2092_v41 = vld [vmem:[%s1865_s8 + $0xb0] sm:$0xff] }
  0x30   : > { %585 = vrot.lane.b32.xlu1 %v1904_v20, %s2654_s10  ;;  %569 = vrot.lane.b32.xlu0 %v531_v21, %s2654_s10  ;;  %2680 = vst [vmem:[#allocation8_spill] sm:$0xff] %v1978_v50  ;;  %v538_v51 = vsel %vm528_vm1, %v535_v45, %v537_v49  ;;  %v473_v1 = vrot.slane %v405_v62, 1  ;;  %v453_v3 = vrot.slane %v393_v63, 1  ;;  %v559_v4 = vrot.slane %v1985_v52, 2  ;;  %v1070_v21 = vld [vmem:[%s2647_s3 + $0x18] sm:$0x7] }
  0x31   : > { %v472_v60 = vsel %vm439_vm0, %v470_v56, %v471_v57  ;;  %v452_v61 = vsel %vm439_vm0, %v450_v58, %v451_v59  ;;  %v560_v5 = vrot.slane %v1998_v54, 2  ;;  %v539_v9 = vrot.slane %v1988_v53, 2  ;;  %2686 = vst [vmem:[#allocation12_spill] sm:$0xff] %v2092_v41 }
  0x32   : > { %v474_v7 = vsel %vm439_vm0, %v471_v57, %v473_v1  ;;  %v454_v8 = vsel %vm439_vm0, %v451_v59, %v453_v3  ;;  %v540_v11 = vrot.slane %v2001_v55, 2  ;;  %v1543_v14 = vpack.c.bf16 %v1068_v13, %v1067_v12 }
  0x33   : > { %v561_v15 = vsel %vm528_vm1, %v559_v4, %v560_v5  ;;  %v1547_v22 = vpack.c.bf16 %v1070_v21, %v1069_v19  ;;  %v562_v23 = vrot.slane %v405_v62, 2  ;;  %v475_v44 = vrot.slane %v2068_v32, 1 }
  0x34   : > { %587 = vrot.lane.b32.xlu1 %v1911_v24, %s2654_s10  ;;  %571 = vrot.lane.b32.xlu0 %v533_v25, %s2654_s10  ;;  %v541_v18 = vsel %vm528_vm1, %v539_v9, %v540_v11  ;;  %v542_v25 = vrot.slane %v393_v63, 2  ;;  %v476_v45 = vrot.slane %v2092_v41, 1  ;;  %v564_v9 = vrot.slane %v2068_v32, 2 }
  0x35   : > { %1544 = vmatprep.subr.bf16.mxu0 %v1543_v14  ;;  %1553 = vmatprep.subr.bf16.mxu1 %v1543_v14  ;;  %v563_v30 = vsel %vm528_vm1, %v560_v5, %v562_v23  ;;  %v544_v12 = vrot.slane %v2071_v33, 2 }
  0x36   : > { %1546 = vmatpush3.bf16.msra.mxu0 %v1543_v14  ;;  %1555 = vmatpush3.bf16.msra.mxu1 %v1543_v14  ;;  %v543_v31 = vsel %vm528_vm1, %v540_v11, %v542_v25  ;;  %v477_v56 = vsel %vm439_vm0, %v475_v44, %v476_v45  ;;  %v565_v11 = vrot.slane %v2092_v41, 2 }
  0x37   : > { %1549 = vmatprep.subr.msk.bf16.mxu0 %vm1548_vm4, %v1547_v22  ;;  %1554 = vmatprep.subr.msk.bf16.mxu1 %vm1548_vm4, %v1547_v22 }
  0x38   : > { %635 = vrot.lane.b32.xlu1 %v1918_v26, %s2650_s13  ;;  %619 = vrot.lane.b32.xlu0 %v1921_v27, %s2650_s13 }
  0x3a   : > { %1552 = vmatpush3.bf16.msk.msra.mxu0 %vm1548_vm4, %v1547_v22  ;;  %1556 = vmatpush3.bf16.msk.msra.mxu1 %vm1548_vm4, %v1547_v22 }
  0x3c   : > { %637 = vrot.lane.b32.xlu1 %v1924_v28, %s2650_s13  ;;  %621 = vrot.lane.b32.xlu0 %v1927_v29, %s2650_s13 }
  0x40   : > { %689 = vrot.lane.b32.xlu1 %v1942_v34, %s2656_s14  ;;  %673 = vrot.lane.b32.xlu0 %v447_v35, %s2656_s14 }
  0x44   : > { %500 = vrot.lane.b32.xlu1 %v1942_v34, %s1739_s9  ;;  %484 = vrot.lane.b32.xlu0 %v447_v35, %s1739_s9 }
  0x48   : > { %691 = vrot.lane.b32.xlu1 %v1956_v42, %s2656_s14  ;;  %675 = vrot.lane.b32.xlu0 %v449_v43, %s2656_s14 }
  0x4c   : > { %742 = vrot.lane.b32.xlu1 %v1965_v46, %s2662_s16  ;;  %726 = vrot.lane.b32.xlu0 %v536_v47, %s2662_s16 }
  0x50   : > { %502 = vrot.lane.b32.xlu1 %v1956_v42, %s1739_s9  ;;  %486 = vrot.lane.b32.xlu0 %v449_v43, %s1739_s9  ;;  %v2095_v43 = vld [vmem:[%s1865_s8 + $0x50] sm:$0xff] }
  0x51   : > { %2687 = vst [vmem:[#allocation13_spill] sm:$0xff] %v2095_v43  ;;  %v456_v48 = vrot.slane %v2095_v43, 1  ;;  %v545_v13 = vrot.slane %v2095_v43, 2 }
  0x53   : > { %v546_v19 = vsel %vm528_vm1, %v544_v12, %v545_v13 }
  0x54   : > { %589 = vrot.lane.b32.xlu1 %v1965_v46, %s2654_s10  ;;  %573 = vrot.lane.b32.xlu0 %v536_v47, %s2654_s10  ;;  %v455_v47 = vrot.slane %v2071_v33, 1 }
  0x56   : > { %v457_v57 = vsel %vm439_vm0, %v455_v47, %v456_v48 }
  0x58   : > { %744 = vrot.lane.b32.xlu1 %v1978_v50, %s2662_s16  ;;  %728 = vrot.lane.b32.xlu0 %v538_v51, %s2662_s16 }
  0x5c   : > { %792 = vrot.lane.b32.xlu1 %v1985_v52, %s2652_s17  ;;  %776 = vrot.lane.b32.xlu0 %v1988_v53, %s2652_s17 }
  0x60   : > { %591 = vrot.lane.b32.xlu1 %v1978_v50, %s2654_s10  ;;  %575 = vrot.lane.b32.xlu0 %v538_v51, %s2654_s10  ;;  %s2682_s10 = smov 6  }
  0x64   : > { %639 = vrot.lane.b32.xlu1 %v1985_v52, %s2650_s13  ;;  %623 = vrot.lane.b32.xlu0 %v1988_v53, %s2650_s13 }
  0x68   : > { %794 = vrot.lane.b32.xlu1 %v1998_v54, %s2652_s17  ;;  %778 = vrot.lane.b32.xlu0 %v2001_v55, %s2652_s17  ;;  %s2660_s17 = smov 24  }
  0x6c   : > { %846 = vrot.lane.b32.xlu1 %v472_v60, %s2658_s26  ;;  %830 = vrot.lane.b32.xlu0 %v452_v61, %s2658_s26 }
  0x70   : > { %641 = vrot.lane.b32.xlu1 %v1998_v54, %s2650_s13  ;;  %625 = vrot.lane.b32.xlu0 %v2001_v55, %s2650_s13 }
  0x74   : > { %693 = vrot.lane.b32.xlu1 %v472_v60, %s2656_s14  ;;  %677 = vrot.lane.b32.xlu0 %v452_v61, %s2656_s14 }
  0x78   : > { %848 = vrot.lane.b32.xlu1 %v474_v7, %s2658_s26  ;;  %832 = vrot.lane.b32.xlu0 %v454_v8, %s2658_s26 }
  0x7c   : > { %899 = vrot.lane.b32.xlu1 %v561_v15, %s2660_s17  ;;  %883 = vrot.lane.b32.xlu0 %v541_v18, %s2660_s17 }
  0x80   : > { %504 = vrot.lane.b32.xlu1 %v472_v60, %s1739_s9  ;;  %488 = vrot.lane.b32.xlu0 %v452_v61, %s1739_s9  ;;  %v408_v60 = vld [vmem:[%s1865_s8 + $0xb8] sm:$0x3] }
  0x81   : > { %v396_v61 = vld [vmem:[%s1865_s8 + $0x58] sm:$0x3]  ;;  %v478_v1 = vrot.slane %v408_v60, 1  ;;  %s2164_s8 = sadd.s32 8, %s1853_s12  ;;  %v567_v44 = vrot.slane %v408_v60, 2 }
  0x82   : > { %v458_v3 = vrot.slane %v396_v61, 1  ;;  %p360_p0 = scmp.lt.s32.totalorder %s2164_s8, 17 }
  0x84   : > { %695 = vrot.lane.b32.xlu1 %v474_v7, %s2656_s14  ;;  %679 = vrot.lane.b32.xlu0 %v454_v8, %s2656_s14  ;;  %s361_s12 = scalar_select %p360_p0, %s2164_s8, 17 }
  0x86   : > { %s1559_s13 = smul.u32 3, %s361_s12 }
  0x88   : > { %746 = vrot.lane.b32.xlu1 %v561_v15, %s2662_s16  ;;  %730 = vrot.lane.b32.xlu0 %v541_v18, %s2662_s16 }
  0x8c   : > { %901 = vrot.lane.b32.xlu1 %v563_v30, %s2660_s17  ;;  %885 = vrot.lane.b32.xlu0 %v543_v31, %s2660_s17 }
  0x90   : > { %506 = vrot.lane.b32.xlu1 %v474_v7, %s1739_s9  ;;  %490 = vrot.lane.b32.xlu0 %v454_v8, %s1739_s9  ;;  %v479_v7 = vsel %vm439_vm0, %v476_v45, %v478_v1  ;;  %v459_v8 = vsel %vm439_vm0, %v456_v48, %v458_v3  ;;  %v547_v45 = vrot.slane %v396_v61, 2 }
  0x94   : > { %593 = vrot.lane.b32.xlu1 %v561_v15, %s2682_s10  ;;  %577 = vrot.lane.b32.xlu0 %v541_v18, %s2682_s10  ;;  %v566_v18 = vsel %vm528_vm1, %v564_v9, %v565_v11 }
  0x98   : > { %748 = vrot.lane.b32.xlu1 %v563_v30, %s2662_s16  ;;  %732 = vrot.lane.b32.xlu0 %v543_v31, %s2662_s16 }
  0x9a   : > { %v2073_v35 = vpop.permute.xlu1 %482  ;;  %v2075_v36 = vpop.permute.xlu0 %480 }
  0x9c   : > { %796 = vrot.lane.b32.xlu1 %v2068_v32, %s2685_s27  ;;  %780 = vrot.lane.b32.xlu0 %v2071_v33, %s2685_s27 }
  0x9e   : > { %v2081_v37 = vpop.permute.xlu1 %498  ;;  %v2083_v38 = vpop.permute.xlu0 %496 }
  0xa0   : > { %595 = vrot.lane.b32.xlu1 %v563_v30, %s2682_s10  ;;  %579 = vrot.lane.b32.xlu0 %v543_v31, %s2682_s10 }
  0xa2   : > { %v2087_v39 = vpop.permute.xlu1 %585  ;;  %v2089_v40 = vpop.permute.xlu0 %569 }
  0xa4   : > { %643 = vrot.lane.b32.xlu1 %v2068_v32, %s2688_s30  ;;  %627 = vrot.lane.b32.xlu0 %v2071_v33, %s2688_s30 }
  0xa6   : > { %v2105_v49 = vpop.permute.xlu1 %587  ;;  %v2107_v51 = vpop.permute.xlu0 %571 }
  0xa8   : > { %798 = vrot.lane.b32.xlu1 %v2092_v41, %s2685_s27  ;;  %782 = vrot.lane.b32.xlu0 %v2095_v43, %s2685_s27 }
  0xaa   : > { %v2115_v58 = vpop.permute.xlu1 %635  ;;  %v2117_v59 = vpop.permute.xlu0 %619 }
  0xac   : > { %850 = vrot.lane.b32.xlu1 %v477_v56, %s2658_s26  ;;  %834 = vrot.lane.b32.xlu0 %v457_v57, %s2658_s26 }
  0xae   : > { %v2123_v62 = vpop.permute.xlu1 %637  ;;  %v2125_v63 = vpop.permute.xlu0 %621 }
  0xb0   : > { %645 = vrot.lane.b32.xlu1 %v2092_v41, %s2688_s30  ;;  %629 = vrot.lane.b32.xlu0 %v2095_v43, %s2688_s30 }
  0xb2   : > { %v2131_v4 = vpop.permute.xlu1 %689  ;;  %v2133_v5 = vpop.permute.xlu0 %673 }
  0xb4   : > { %697 = vrot.lane.b32.xlu1 %v477_v56, %s2656_s14  ;;  %681 = vrot.lane.b32.xlu0 %v457_v57, %s2656_s14 }
  0xb6   : > { %v2143_v14 = vpop.permute.xlu1 %500  ;;  %v2145_v15 = vpop.permute.xlu0 %484 }
  0xb7   : > { %v942_v33 = vsel %vm931_vm5, %v1918_v26, %v2143_v14  ;;  %v934_v32 = vsel %vm931_vm5, %v1921_v27, %v2145_v15 }
  0xb8   : > { %852 = vrot.lane.b32.xlu1 %v479_v7, %s2658_s26  ;;  %836 = vrot.lane.b32.xlu0 %v459_v8, %s2658_s26 }
  0xba   : > { %v2151_v21 = vpop.permute.xlu1 %691  ;;  %v2153_v22 = vpop.permute.xlu0 %675 }
  0xbc   : > { %903 = vrot.lane.b32.xlu1 %v566_v18, %s2660_s17  ;;  %887 = vrot.lane.b32.xlu0 %v546_v19, %s2660_s17 }
  0xbe   : > { %v2157_v23 = vpop.permute.xlu1 %742  ;;  %v2159_v25 = vpop.permute.xlu0 %726 }
  0xc0   : > { %508 = vrot.lane.b32.xlu1 %v477_v56, %s1739_s9  ;;  %492 = vrot.lane.b32.xlu0 %v457_v57, %s1739_s9  ;;  %v568_v56 = vsel %vm528_vm1, %v565_v11, %v567_v44  ;;  %v548_v57 = vsel %vm528_vm1, %v545_v13, %v547_v45 }
  0xc2   : > { %v2166_v30 = vpop.permute.xlu1 %502  ;;  %v2168_v31 = vpop.permute.xlu0 %486 }
  0xc4   : > { %699 = vrot.lane.b32.xlu1 %v479_v7, %s2656_s14  ;;  %683 = vrot.lane.b32.xlu0 %v459_v8, %s2656_s14  ;;  %s364_s14 = sadd.s32 %s1559_s13, %s1859_s15 }
  0xc5   : > { %s1450_s26 = sshll.u32 %s364_s14, 3  ;;  %s2691_s14 = smov 12  }
  0xc6   : > { %v590_v47 = vpop.permute.xlu1 %589  ;;  %v574_v48 = vpop.permute.xlu0 %573 }
  0xc8   : > { %750 = vrot.lane.b32.xlu1 %v566_v18, %s2662_s16  ;;  %734 = vrot.lane.b32.xlu0 %v546_v19, %s2662_s16  ;;  %s2200_s16 = scalar_lea.vmem %s2645_s1, %s1450_s26  ;;  %s1490_s26 = sshll.u32 %s1721_s21, 4 }
  0xc9   : > { %v2222_v41 = vld [vmem:[%s2200_s16 + $0x8] sm:$0xff] }
  0xca   : > { %v2178_v1 = vpop.permute.xlu1 %744  ;;  %v2180_v3 = vpop.permute.xlu0 %728  ;;  %v669_v46 = vrot.slane %v2222_v41, 1 }
  0xcc   : > { %905 = vrot.lane.b32.xlu1 %v568_v56, %s2660_s17  ;;  %889 = vrot.lane.b32.xlu0 %v548_v57, %s2660_s17  ;;  %s2693_s17 = smov 24  }
  0xce   : > { %v2184_v60 = vpop.permute.xlu1 %792  ;;  %v2186_v61 = vpop.permute.xlu0 %776 }
  0xd0   : > { %510 = vrot.lane.b32.xlu1 %v479_v7, %s1739_s9  ;;  %494 = vrot.lane.b32.xlu0 %v459_v8, %s1739_s9  ;;  %v2205_v7 = vld [vmem:[%s2200_s16] sm:$0xff]  ;;  %s2690_s9 = smov 21  }
  0xd1   : > { %v668_v50 = vrot.slane %v2205_v7, 1 }
  0xd2   : > { %v2191_v9 = vpop.permute.xlu1 %591  ;;  %v2193_v11 = vpop.permute.xlu0 %575 }
  0xd4   : > { %597 = vrot.lane.b32.xlu1 %v566_v18, %s2682_s10  ;;  %581 = vrot.lane.b32.xlu0 %v546_v19, %s2682_s10 }
  0xd6   : > { %v640_v12 = vpop.permute.xlu1 %639  ;;  %v624_v13 = vpop.permute.xlu0 %623 }
  0xd8   : > { %752 = vrot.lane.b32.xlu1 %v568_v56, %s2689_s0  ;;  %736 = vrot.lane.b32.xlu0 %v548_v57, %s2689_s0 }
  0xda   : > { %v2207_v8 = vpop.permute.xlu1 %794  ;;  %v2209_v18 = vpop.permute.xlu0 %778 }
  0xdc   : > { %800 = vrot.lane.b32.xlu1 %v2205_v7, %s2685_s27  ;;  %784 = vrot.lane.b32.xlu0 %v1882_v10, %s2685_s27 }
  0xde   : > { %v847_v19 = vpop.permute.xlu1 %846  ;;  %v831_v44 = vpop.permute.xlu0 %830 }
  0xe0   : > { %599 = vrot.lane.b32.xlu1 %v568_v56, %s2682_s10  ;;  %583 = vrot.lane.b32.xlu0 %v548_v57, %s2682_s10  ;;  %v959_v56 = vsel %vm948_vm6, %v942_v33, %v590_v47  ;;  %v951_v57 = vsel %vm948_vm6, %v934_v32, %v574_v48  ;;  %v932_v32 = vsel %vm931_vm5, %v1872_v2, %v2075_v36 }
  0xe1   : > { %v976_v14 = vsel %vm965_vm7, %v959_v56, %v640_v12  ;;  %v968_v42 = vsel %vm965_vm7, %v951_v57, %v624_v13  ;;  %v940_v33 = vsel %vm931_vm5, %v1882_v10, %v2083_v38  ;;  %v670_v48 = vsel %vm439_vm0, %v668_v50, %v669_v46 }
  0xe2   : > { %v2217_v45 = vpop.permute.xlu1 %641  ;;  %v2219_v43 = vpop.permute.xlu0 %625  ;;  %v957_v47 = vsel %vm948_vm6, %v940_v33, %v2087_v39  ;;  %v722_v33 = vrot.slane %v2222_v41, 2 }
  0xe3   : > { %v974_v2 = vsel %vm965_vm7, %v957_v47, %v2115_v58 }
  0xe4   : > { %647 = vrot.lane.b32.xlu1 %v2205_v7, %s2688_s30  ;;  %631 = vrot.lane.b32.xlu0 %v1882_v10, %s2688_s30  ;;  %v991_v39 = vsel %vm982_vm8, %v974_v2, %v2131_v4 }
  0xe5   : > { %v1008_v50 = vsel %vm999_vm9, %v991_v39, %v2157_v23 }
  0xe6   : > { %v694_v27 = vpop.permute.xlu1 %693  ;;  %v678_v15 = vpop.permute.xlu0 %677 }
  0xe7   : > { %v2241_v34 = vsel %vm982_vm8, %v976_v14, %v694_v27  ;;  %v2244_v55 = vsel %vm982_vm8, %v968_v42, %v678_v15  ;;  %v949_v42 = vsel %vm948_vm6, %v932_v32, %v2089_v40  ;;  %v935_v14 = vsel %vm931_vm5, %v1927_v29, %v2168_v31 }
  0xe8   : > { %802 = vrot.lane.b32.xlu1 %v2222_v41, %s2685_s27  ;;  %786 = vrot.lane.b32.xlu0 %v1877_v6, %s2685_s27  ;;  %v966_v10 = vsel %vm965_vm7, %v949_v42, %v2117_v59  ;;  %v1025_v59 = vsel %vm1016_vm10, %v1008_v50, %v2184_v60  ;;  %v721_v27 = vrot.slane %v2205_v7, 2  ;;  %v952_v32 = vsel %vm948_vm6, %v935_v14, %v2193_v11 }
  0xe9   : > { %v983_v40 = vsel %vm982_vm8, %v966_v10, %v2133_v5  ;;  %v2285_v5 = vld [vmem:[%s2200_s16 + $0x10] sm:$0x3]  ;;  %v1042_v23 = vsel %vm1033_vm11, %v1025_v59, %v847_v19  ;;  %s371_s16 = sadd.s32 1, %s2164_s8  ;;  %v969_v31 = vsel %vm965_vm7, %v952_v32, %v2219_v43 }
  0xea   : > { %v2265_v36 = vpop.permute.xlu1 %848  ;;  %v2267_v38 = vpop.permute.xlu0 %832  ;;  %v1000_v58 = vsel %vm999_vm9, %v983_v40, %v2159_v25  ;;  %v671_v60 = vrot.slane %v2285_v5, 1  ;;  %p2332_p1 = scmp.lt.s32.totalorder %s371_s16, 17 }
  0xeb   : > { %v1017_v4 = vsel %vm1016_vm10, %v1000_v58, %v2186_v61 }
  0xec   : > { %854 = vrot.lane.b32.xlu1 %v670_v48, %s2690_s9  ;;  %838 = vrot.lane.b32.xlu0 %v1895_v17, %s2690_s9  ;;  %v1034_v12 = vsel %vm1033_vm11, %v1017_v4, %v831_v44  ;;  %v943_v44 = vsel %vm931_vm5, %v1924_v28, %v2166_v30  ;;  %v672_v30 = vsel %vm439_vm0, %v669_v46, %v671_v60  ;;  %s2717_s16 = smov (!%p2332_p1, %s371_s16), 17 }
  0xed   : > { %v960_v15 = vsel %vm948_vm6, %v943_v44, %v2191_v9  ;;  %v941_v46 = vsel %vm931_vm5, %v1877_v6, %v2081_v37  ;;  %s1560_s10 = smul.u32 3, %s2717_s16 }
  0xee   : > { %v900_v25 = vpop.permute.xlu1 %899  ;;  %v884_v13 = vpop.permute.xlu0 %883  ;;  %v977_v29 = vsel %vm965_vm7, %v960_v15, %v2217_v45 }
  0xef   : > { %v1059_v56 = vsel %vm1050_vm12, %v1042_v23, %v900_v25  ;;  %v1051_v57 = vsel %vm1050_vm12, %v1034_v12, %v884_v13 }
  0xf0   : > { %649 = vrot.lane.b32.xlu1 %v2222_v41, %s2688_s30  ;;  %1531 = vmatprep.mubr.msk.f32.mxu1 %vm1078_vm13, %v1059_v56  ;;  %v958_v41 = vsel %vm948_vm6, %v941_v46, %v2105_v49  ;;  %v2694_v56 = vld [vmem:[#allocation9_spill] sm:$0xff] }
  0xf1   : > { %633 = vrot.lane.b32.xlu0 %v1877_v6, %s2688_s30  ;;  %1519 = vmatprep.mubr.msk.f32.mxu0 %vm1078_vm13, %v1051_v57  ;;  %v975_v6 = vsel %vm965_vm7, %v958_v41, %v2123_v62  ;;  %s378_s30 = sadd.s32 %s1560_s10, %s1859_s15 }
  0xf2   : > { %v505_v61 = vpop.permute.xlu1 %504  ;;  %v489_v19 = vpop.permute.xlu0 %488  ;;  %v992_v49 = vsel %vm982_vm8, %v975_v6, %v2151_v21  ;;  %s1452_s8 = sshll.u32 %s378_s30, 3 }
  0xf3   : > { %v1009_v42 = vsel %vm999_vm9, %v992_v49, %v2178_v1  ;;  %v944_v39 = vsel %vm931_vm5, %v1985_v52, %v505_v61  ;;  %s380_s12 = scalar_lea.vmem %s2646_s2, %s1452_s8 }
  0xf4   : > { %701 = vrot.lane.b32.xlu1 %v670_v48, %s2691_s14  ;;  %v1026_v62 = vsel %vm1016_vm10, %v1009_v42, %v2207_v8  ;;  %v724_v8 = vrot.slane %v2285_v5, 2  ;;  %v412_v52 = vld [vmem:[%s380_s12] sm:$0xff]  ;;  %v413_v23 = vld [vmem:[%s380_s12 + $0x8] sm:$0xff]  ;;  %v414_v60 = vld [vmem:[%s380_s12 + $0x10] sm:$0x3] }
  0xf5   : > { %685 = vrot.lane.b32.xlu0 %v1895_v17, %s2691_s14  ;;  %v933_v17 = vsel %vm931_vm5, %v1868_v0, %v2073_v35  ;;  %v723_v0 = vsel %vm528_vm1, %v721_v27, %v722_v33  ;;  %v1043_v21 = vsel %vm1033_vm11, %v1026_v62, %v2265_v36  ;;  %v825_v12 = vrot.slane %v412_v52, 1 }
  0xf6   : > { %v696_v7 = vpop.permute.xlu1 %695  ;;  %v680_v47 = vpop.permute.xlu0 %679  ;;  %v950_v43 = vsel %vm948_vm6, %v933_v17, %v2107_v51  ;;  %v826_v25 = vrot.slane %v413_v23, 1  ;;  %v828_v14 = vrot.slane %v414_v60, 1  ;;  %v881_v46 = vrot.slane %v414_v60, 2 }
  0xf7   : > { %v2320_v9 = vsel %vm982_vm8, %v977_v29, %v696_v7  ;;  %v2323_v11 = vsel %vm982_vm8, %v969_v31, %v680_v47  ;;  %v967_v35 = vsel %vm965_vm7, %v950_v43, %v2125_v63  ;;  %v2695_v29 = vld [vmem:[#allocation5_spill] sm:$0xff]  ;;  %v2696_v47 = vld [vmem:[#allocation6_spill] sm:$0xff] }
  0xf8   : > { %856 = vrot.lane.b32.xlu1 %v672_v30, %s2690_s9  ;;  %v984_v51 = vsel %vm982_vm8, %v967_v35, %v2153_v22  ;;  %v829_v31 = vsel %vm439_vm0, %v826_v25, %v828_v14 }
  0xf9   : > { %840 = vrot.lane.b32.xlu0 %v1892_v16, %s2690_s9  ;;  %v1001_v48 = vsel %vm999_vm9, %v984_v51, %v2180_v3 }
  0xfa   : > { %v2347_v37 = vpop.permute.xlu1 %746  ;;  %v2349_v45 = vpop.permute.xlu0 %730  ;;  %v1018_v63 = vsel %vm1016_vm10, %v1001_v48, %v2209_v18  ;;  %v2698_v48 = vld [vmem:[#allocation8_spill] sm:$0xff] }
  0xfb   : > { %v1035_v22 = vsel %vm1033_vm11, %v1018_v63, %v2267_v38  ;;  %v725_v38 = vsel %vm528_vm1, %v722_v33, %v724_v8  ;;  %v878_v33 = vrot.slane %v412_v52, 2 }
  0xfc   : > { %907 = vrot.lane.b32.xlu1 %v723_v0, %s2693_s17 }
  0xfd   : > { %891 = vrot.lane.b32.xlu0 %v1904_v20, %s2693_s17 }
  0xfe   : > { %v902_v1 = vpop.permute.xlu1 %901  ;;  %v886_v3 = vpop.permute.xlu0 %885 }
  0xff   : > { %v1060_v2 = vsel %vm1050_vm12, %v1043_v21, %v902_v1  ;;  %v1052_v10 = vsel %vm1050_vm12, %v1035_v22, %v886_v3 }
 0x100   : > { %703 = vrot.lane.b32.xlu1 %v672_v30, %s2691_s14  ;;  %1532 = vmatmul.mubr.msk.f32.vlgmr.msra.gmra.mrb[0].mxu1 %vm1078_vm13, %v1060_v2  ;;  %v879_v30 = vrot.slane %v413_v23, 2  ;;  %v1010_v2 = vsel %vm999_vm9, %v2241_v34, %v2347_v37 }
 0x101   : > { %687 = vrot.lane.b32.xlu0 %v1892_v16, %s2691_s14  ;;  %1520 = vmatmul.mubr.msk.f32.vlgmr.msra.gmra.mrb[0].mxu0 %vm1078_vm13, %v1052_v10  ;;  %v936_v16 = vsel %vm931_vm5, %v1988_v53, %v489_v19  ;;  %v1002_v10 = vsel %vm999_vm9, %v2244_v55, %v2349_v45 }
 0x102   : > { %v507_v18 = vpop.permute.xlu1 %506  ;;  %v491_v36 = vpop.permute.xlu0 %490  ;;  %v880_v17 = vsel %vm528_vm1, %v878_v33, %v879_v30  ;;  %v882_v6 = vsel %vm528_vm1, %v879_v30, %v881_v46 }
 0x103   : > { %v945_v13 = vsel %vm931_vm5, %v1998_v54, %v507_v18  ;;  %v937_v57 = vsel %vm931_vm5, %v2694_v56, %v491_v36 }
 0x104   : > { %754 = vrot.lane.b32.xlu1 %v723_v0, %s2689_s0  ;;  %v2697_v0 = vld [vmem:[#allocation7_spill] sm:$0xff] }
 0x105   : > { %738 = vrot.lane.b32.xlu0 %v1904_v20, %s2689_s0 }
 0x106   : > { %v594_v40 = vpop.permute.xlu1 %593  ;;  %v578_v50 = vpop.permute.xlu0 %577 }
 0x107   : > { %v961_v58 = vsel %vm948_vm6, %v944_v39, %v594_v40  ;;  %v953_v59 = vsel %vm948_vm6, %v936_v16, %v578_v50 }
 0x108   : > { %909 = vrot.lane.b32.xlu1 %v725_v38, %s2693_s17 }
 0x109   : > { %893 = vrot.lane.b32.xlu0 %v1911_v24, %s2693_s17 }
 0x10a   : > { %v2394_v20 = vpop.permute.xlu1 %748  ;;  %v2396_v4 = vpop.permute.xlu0 %732 }
 0x10c   : > { %756 = vrot.lane.b32.xlu1 %v725_v38, %s2689_s0 }
 0x10d   : > { %740 = vrot.lane.b32.xlu0 %v1911_v24, %s2689_s0  ;;  %s332_s0 = sand.u32 1, %s1713_s19  }
 0x10e   : > { %v797_v53 = vpop.permute.xlu1 %796  ;;  %v781_v5 = vpop.permute.xlu0 %780 }
 0x10f   : > { %v1027_v8 = vsel %vm1016_vm10, %v1010_v2, %v797_v53  ;;  %v1019_v18 = vsel %vm1016_vm10, %v1002_v10, %v781_v5  ;;  %v1011_v5 = vsel %vm999_vm9, %v2320_v9, %v2394_v20  ;;  %v2699_v20 = vld [vmem:[#allocation10_spill] sm:$0xff] }
 0x110   : > { %804 = vrot.lane.b32.xlu1 %v412_v52, %s2685_s27 }
 0x111   : > { %788 = vrot.lane.b32.xlu0 %v1918_v26, %s2685_s27  ;;  %v827_v26 = vsel %vm439_vm0, %v825_v12, %v826_v25 }
 0x112   : > { %v596_v61 = vpop.permute.xlu1 %595  ;;  %v580_v24 = vpop.permute.xlu0 %579 }
 0x113   : > { %v962_v19 = vsel %vm948_vm6, %v945_v13, %v596_v61  ;;  %v954_v44 = vsel %vm948_vm6, %v937_v57, %v580_v24 }
 0x114   : > { %806 = vrot.lane.b32.xlu1 %v413_v23, %s2685_s27  ;;  %v1003_v23 = vsel %vm999_vm9, %v2323_v11, %v2396_v4 }
 0x115   : > { %790 = vrot.lane.b32.xlu0 %v1924_v28, %s2685_s27  ;;  %s1446_s27 = sshll.u32 %s332_s0, 7 }
 0x116   : > { %v644_v27 = vpop.permute.xlu1 %643  ;;  %v628_v54 = vpop.permute.xlu0 %627  ;;  %s2546_s16 = scalar_lea.vmem [#allocation2], %s1446_s27  ;;  %s1748_s27 = smov [#allocation2]  }
 0x117   : > { %v978_v15 = vsel %vm965_vm7, %v961_v58, %v644_v27  ;;  %v970_v32 = vsel %vm965_vm7, %v953_v59, %v628_v54  ;;  %s1310_s8 = sshll.u32 %s2546_s16, 4  ;;  %s2580_s8 = int_to_ptr.vmem [resolvable:$true] %s1310_s8 }
 0x118   : > { %858 = vrot.lane.b32.xlu1 %v827_v26, %s2690_s9  ;;  %s1643_s12 = scalar_lea.vmem %s2580_s8, 2048 }
 0x119   : > { %842 = vrot.lane.b32.xlu0 %v2695_v29, %s2690_s9  ;;  %p1644_p2 = scmp.ne.s32.totalorder %s2580_s8, %s1643_s12 }
 0x11a   : > { %v799_v7 = vpop.permute.xlu1 %798  ;;  %v783_v28 = vpop.permute.xlu0 %782 }
 0x11b   : > { %v1028_v12 = vsel %vm1016_vm10, %v1011_v5, %v799_v7  ;;  %v1020_v25 = vsel %vm1016_vm10, %v1003_v23, %v783_v28  ;;  %p1645_p4 = pnand %p1644_p2, %p1832_p3 }
 0x11c   : > { %860 = vrot.lane.b32.xlu1 %v829_v31, %s2690_s9 }
 0x11d   : > { %844 = vrot.lane.b32.xlu0 %v2696_v47, %s2690_s9  ;;  %p1646_p5 = pneg %p1645_p4  ;;  %s1647_s9 = sshll.u32 %s1748_s27, 4  ;;  %s1648_s9 = int_to_ptr.vmem [resolvable:$false] %s1647_s9 }
 0x11e   : > { %v851_v41 = vpop.permute.xlu1 %850  ;;  %v835_v43 = vpop.permute.xlu0 %834  ;;  %s1649_s14 = scalar_lea.vmem %s1648_s9, 4096  ;;  %p1650_p6 = scmp.lt.s32.totalorder %s2580_s8, %s1648_s9 }
 0x11f   : > { %v1044_v36 = vsel %vm1033_vm11, %v1027_v8, %v851_v41  ;;  %v1036_v38 = vsel %vm1033_vm11, %v1019_v18, %v835_v43  ;;  %p1651_p7 = scmp.lt.s32.totalorder %s1649_s14, %s1643_s12 }
 0x120   : > { %911 = vrot.lane.b32.xlu1 %v880_v17, %s2693_s17 }
 0x121   : > { %895 = vrot.lane.b32.xlu0 %v2697_v0, %s2693_s17  ;;  %p1652_p9 = por %p1651_p7, %p1650_p6 }
 0x122   : > { %v646_v35 = vpop.permute.xlu1 %645  ;;  %v630_v49 = vpop.permute.xlu0 %629 }
 0x123   : > { %v979_v51 = vsel %vm965_vm7, %v962_v19, %v646_v35  ;;  %v971_v42 = vsel %vm965_vm7, %v954_v44, %v630_v49  ;;  %v2700_v19 = vld [vmem:[#allocation11_spill] sm:$0xff]  ;;  %p1653_p10 = pnand %p1652_p9, %p1646_p5 }
 0x124   : > { %913 = vrot.lane.b32.xlu1 %v882_v6, %s2693_s17 }
 0x125   : > { %897 = vrot.lane.b32.xlu0 %v2698_v48, %s2693_s17  ;;  %s1474_s17 = sshll.u32 %s1725_s22, 5  ;;  %s2592_s22 = scalar_lea.sflag [#allocation3], %s332_s0 }
 0x126   : > { %v698_v62 = vpop.permute.xlu1 %697  ;;  %v682_v63 = vpop.permute.xlu0 %681  ;;  %s1307_s10 = sadd.s32 %s1490_s26, %s1474_s17 }
 0x127   : > { %v2437_v21 = vsel %vm982_vm8, %v978_v15, %v698_v62  ;;  %v2440_v22 = vsel %vm982_vm8, %v970_v32, %v682_v63  ;;  %s1475_s30 = sshll.u32 %s1307_s10, 7 }
 0x128   : > { %s2578_s21 = scalar_lea.hbm %s2649_s5, %s1475_s30 }
 0x12a   : > { %v853_v1 = vpop.permute.xlu1 %852  ;;  %v837_v3 = vpop.permute.xlu0 %836 }
 0x12b   : > { %v1045_v13 = vsel %vm1033_vm11, %v1028_v12, %v853_v1  ;;  %v1037_v56 = vsel %vm1033_vm11, %v1020_v25, %v837_v3 }
 0x12e   : > { %v904_v39 = vpop.permute.xlu1 %903  ;;  %v888_v16 = vpop.permute.xlu0 %887 }
 0x12f   : > { %v1061_v40 = vsel %vm1050_vm12, %v1044_v36, %v904_v39  ;;  %v1053_v50 = vsel %vm1050_vm12, %v1036_v38, %v888_v16 }
 0x130   : > { %1522 = vmatprep.mubr.msk.f32.mxu0 %vm1078_vm13, %v1053_v50  ;;  %1534 = vmatprep.mubr.msk.f32.mxu1 %vm1078_vm13, %v1061_v40 }
 0x132   : > { %v509_v34 = vpop.permute.xlu1 %508  ;;  %v493_v55 = vpop.permute.xlu0 %492 }
 0x133   : > { %v946_v4 = vsel %vm931_vm5, %v2699_v20, %v509_v34  ;;  %v938_v44 = vsel %vm931_vm5, %v2700_v19, %v493_v55 }
 0x136   : > { %v700_v37 = vpop.permute.xlu1 %699  ;;  %v684_v45 = vpop.permute.xlu0 %683 }
 0x137   : > { %v996_v58 = vsel %vm982_vm8, %v979_v51, %v700_v37  ;;  %v988_v59 = vsel %vm982_vm8, %v971_v42, %v684_v45 }
 0x13a   : > { %v751_v52 = vpop.permute.xlu1 %750  ;;  %v735_v53 = vpop.permute.xlu0 %734 }
 0x13b   : > { %v1012_v42 = vsel %vm999_vm9, %v2437_v21, %v751_v52  ;;  %v1004_v48 = vsel %vm999_vm9, %v2440_v22, %v735_v53 }
 0x13e   : > { %v906_v57 = vpop.permute.xlu1 %905  ;;  %v890_v60 = vpop.permute.xlu0 %889 }
 0x13f   : > { %v1062_v61 = vsel %vm1050_vm12, %v1045_v13, %v906_v57  ;;  %v1054_v24 = vsel %vm1050_vm12, %v1037_v56, %v890_v60 }
 0x140   : > { %1523 = vmatmul.mubr.msk.f32.gmra.mrb[2].mxu0 %vm1078_vm13, %v1054_v24  ;;  %1535 = vmatmul.mubr.msk.f32.gmra.mrb[2].mxu1 %vm1078_vm13, %v1062_v61 }
 0x142   : > { %v2472_v9 = vpop.permute.xlu1 %510  ;;  %v2474_v11 = vpop.permute.xlu0 %494 }
 0x146   : > { %v598_v26 = vpop.permute.xlu1 %597  ;;  %v582_v14 = vpop.permute.xlu0 %581 }
 0x147   : > { %v963_v27 = vsel %vm948_vm6, %v946_v4, %v598_v26  ;;  %v955_v54 = vsel %vm948_vm6, %v938_v44, %v582_v14  ;;  %v2701_v4 = vld [vmem:[#allocation12_spill] sm:$0xff]  ;;  %v2702_v14 = vld [vmem:[#allocation13_spill] sm:$0xff] }
 0x148   : > { %v947_v19 = vsel %vm931_vm5, %v2701_v4, %v2472_v9 }
 0x14a   : > { %v753_v15 = vpop.permute.xlu1 %752  ;;  %v737_v32 = vpop.permute.xlu0 %736 }
 0x14b   : > { %v1013_v39 = vsel %vm999_vm9, %v996_v58, %v753_v15  ;;  %v1005_v16 = vsel %vm999_vm9, %v988_v59, %v737_v32  ;;  %v939_v15 = vsel %vm931_vm5, %v2702_v14, %v2474_v11 }
 0x14e   : > { %v801_v33 = vpop.permute.xlu1 %800  ;;  %v785_v30 = vpop.permute.xlu0 %784 }
 0x14f   : > { %v1029_v62 = vsel %vm1016_vm10, %v1012_v42, %v801_v33  ;;  %v1021_v63 = vsel %vm1016_vm10, %v1004_v48, %v785_v30 }
 0x152   : > { %v600_v29 = vpop.permute.xlu1 %599  ;;  %v584_v31 = vpop.permute.xlu0 %583 }
 0x153   : > { %v956_v33 = vsel %vm948_vm6, %v939_v15, %v584_v31 }
 0x156   : > { %v648_v7 = vpop.permute.xlu1 %647  ;;  %v632_v28 = vpop.permute.xlu0 %631 }
 0x157   : > { %v980_v57 = vsel %vm965_vm7, %v963_v27, %v648_v7  ;;  %v972_v61 = vsel %vm965_vm7, %v955_v54, %v632_v28  ;;  %v964_v27 = vsel %vm948_vm6, %v947_v19, %v600_v29 }
 0x15a   : > { %v803_v47 = vpop.permute.xlu1 %802  ;;  %v787_v17 = vpop.permute.xlu0 %786 }
 0x15b   : > { %v1030_v40 = vsel %vm1016_vm10, %v1013_v39, %v803_v47  ;;  %v1022_v50 = vsel %vm1016_vm10, %v1005_v16, %v787_v17 }
 0x15e   : > { %v855_v46 = vpop.permute.xlu1 %854  ;;  %v839_v41 = vpop.permute.xlu0 %838 }
 0x15f   : > { %v1046_v1 = vsel %vm1033_vm11, %v1029_v62, %v855_v46  ;;  %v1038_v2 = vsel %vm1033_vm11, %v1021_v63, %v839_v41 }
 0x162   : > { %v650_v43 = vpop.permute.xlu1 %649 }
 0x163   : > { %v634_v0 = vpop.permute.xlu0 %633  ;;  %v981_v30 = vsel %vm965_vm7, %v964_v27, %v650_v43 }
 0x164   : > { %v973_v47 = vsel %vm965_vm7, %v956_v33, %v634_v0 }
 0x166   : > { %v702_v6 = vpop.permute.xlu1 %701 }
 0x167   : > { %v686_v35 = vpop.permute.xlu0 %685  ;;  %v997_v24 = vsel %vm982_vm8, %v980_v57, %v702_v6 }
 0x168   : > { %v989_v44 = vsel %vm982_vm8, %v972_v61, %v686_v35 }
 0x16a   : > { %v857_v49 = vpop.permute.xlu1 %856 }
 0x16b   : > { %v841_v51 = vpop.permute.xlu0 %840  ;;  %v1047_v34 = vsel %vm1033_vm11, %v1030_v40, %v857_v49 }
 0x16c   : > { %v1039_v37 = vsel %vm1033_vm11, %v1022_v50, %v841_v51 }
 0x16e   : > { %v908_v3 = vpop.permute.xlu1 %907 }
 0x16f   : > { %v1063_v10 = vsel %vm1050_vm12, %v1046_v1, %v908_v3  ;;  %v892_v8 = vpop.permute.xlu0 %891  ;;  %v1453_v1 = vld [vmem:[%s2648_s4] ss:$0 sm:$0xff] }
 0x170   : > { %v1055_v18 = vsel %vm1050_vm12, %v1038_v2, %v892_v8  ;;  %1537 = vmatprep.mubr.msk.f32.mxu1 %vm1078_vm13, %v1063_v10 }
 0x171   : > { %1525 = vmatprep.mubr.msk.f32.mxu0 %vm1078_vm13, %v1055_v18 }
 0x172   : > { %v704_v21 = vpop.permute.xlu1 %703 }
 0x173   : > { %v688_v22 = vpop.permute.xlu0 %687  ;;  %v998_v17 = vsel %vm982_vm8, %v981_v30, %v704_v21 }
 0x174   : > { %v990_v41 = vsel %vm982_vm8, %v973_v47, %v688_v22 }
 0x176   : > { %v755_v36 = vpop.permute.xlu1 %754 }
 0x177   : > { %v739_v38 = vpop.permute.xlu0 %738  ;;  %v1014_v26 = vsel %vm999_vm9, %v997_v24, %v755_v36 }
 0x178   : > { %v1006_v32 = vsel %vm999_vm9, %v989_v44, %v739_v38 }
 0x17a   : > { %v910_v55 = vpop.permute.xlu1 %909 }
 0x17b   : > { %v1064_v45 = vsel %vm1050_vm12, %v1047_v34, %v910_v55  ;;  %v894_v52 = vpop.permute.xlu0 %893 }
 0x17c   : > { %v1056_v53 = vsel %vm1050_vm12, %v1039_v37, %v894_v52  ;;  %1538 = vmatmul.mubr.msk.f32.gmra.mrb[4].mxu1 %vm1078_vm13, %v1064_v45 }
 0x17d   : > { %1526 = vmatmul.mubr.msk.f32.gmra.mrb[4].mxu0 %vm1078_vm13, %v1056_v53 }
 0x17e   : > { %v757_v58 = vpop.permute.xlu1 %756 }
 0x17f   : > { %v741_v59 = vpop.permute.xlu0 %740  ;;  %v1015_v31 = vsel %vm999_vm9, %v998_v17, %v757_v58 }
 0x180   : > { %v1007_v6 = vsel %vm999_vm9, %v990_v41, %v741_v59 }
 0x182   : > { %v805_v5 = vpop.permute.xlu1 %804 }
 0x183   : > { %v789_v23 = vpop.permute.xlu0 %788  ;;  %v1031_v54 = vsel %vm1016_vm10, %v1014_v26, %v805_v5 }
 0x184   : > { %v1023_v9 = vsel %vm1016_vm10, %v1006_v32, %v789_v23 }
 0x186   : > { %v807_v12 = vpop.permute.xlu1 %806 }
 0x187   : > { %v791_v25 = vpop.permute.xlu0 %790  ;;  %v1032_v0 = vsel %vm1016_vm10, %v1015_v31, %v807_v12 }
 0x188   : > { %v1024_v35 = vsel %vm1016_vm10, %v1007_v6, %v791_v25 }
 0x18a   : > { %v859_v13 = vpop.permute.xlu1 %858 }
 0x18b   : > { %v843_v56 = vpop.permute.xlu0 %842  ;;  %v1048_v7 = vsel %vm1033_vm11, %v1031_v54, %v859_v13 }
 0x18c   : > { %v1040_v11 = vsel %vm1033_vm11, %v1023_v9, %v843_v56 }
 0x18e   : > { %v861_v60 = vpop.permute.xlu1 %860 }
 0x18f   : > { %v845_v20 = vpop.permute.xlu0 %844  ;;  %v1049_v49 = vsel %vm1033_vm11, %v1032_v0, %v861_v60 }
 0x190   : > { %v1041_v42 = vsel %vm1033_vm11, %v1024_v35, %v845_v20 }
 0x192   : > { %v912_v28 = vpop.permute.xlu1 %911 }
 0x193   : > { %v1065_v29 = vsel %vm1050_vm12, %v1048_v7, %v912_v28  ;;  %v896_v46 = vpop.permute.xlu0 %895 }
 0x194   : > { %v1057_v43 = vsel %vm1050_vm12, %v1040_v11, %v896_v46  ;;  %1540 = vmatprep.mubr.msk.f32.mxu1 %vm1078_vm13, %v1065_v29 }
 0x195   : > { %1528 = vmatprep.mubr.msk.f32.mxu0 %vm1078_vm13, %v1057_v43 }
 0x196   : > { %v914_v51 = vpop.permute.xlu1 %913 }
 0x197   : > { %v1066_v48 = vsel %vm1050_vm12, %v1049_v49, %v914_v51  ;;  %v898_v62 = vpop.permute.xlu0 %897 }
 0x198   : > { %v1058_v63 = vsel %vm1050_vm12, %v1041_v42, %v898_v62  ;;  %1541 = vmatmul.mubr.msk.f32.gmra.mrb[6].mxu1 %vm1078_vm13, %v1066_v48 }
 0x199   : > { %1529 = vmatmul.mubr.msk.f32.gmra.mrb[6].mxu0 %vm1078_vm13, %v1058_v63 }
 0x1d3   : > { %v1533_v3 = vpop.f32.mrb[0].mxu1 }
 0x1d4   : > { %v1521_v2 = vpop.f32.mrb[0].mxu0  ;;  %v1243_v10 = vadd.f32 %v1533_v3, %v1453_v1  ;;  %v1237_v8 = vpop.f32.mrb[1].mxu1 }
 0x1d5   : > { %v1203_v18 = vadd.f32 %v1521_v2, %v1453_v1  ;;  %v1197_v21 = vpop.f32.mrb[1].mxu0  ;;  %v1238_v22 = vadd.f32 %v1453_v1, %v1237_v8 }
 0x1d6   : > { %1286 = vst.msk [vmem:[%s2546_s16 + $0x48] sm:$0xff] %vm1276_vm14, %v1243_v10  ;;  %v1198_v36 = vadd.f32 %v1453_v1, %v1197_v21 }
 0x1d7   : > { %1278 = vst.msk [vmem:[%s2546_s16 + $0x8] sm:$0xff] %vm1276_vm14, %v1203_v18  ;;  %1285 = vst.msk [vmem:[%s2546_s16 + $0x40] sm:$0xff] %vm1276_vm14, %v1238_v22 }
 0x1d8   : > { %1277 = vst.msk [vmem:[%s2546_s16] sm:$0xff] %vm1276_vm14, %v1198_v36 }
 0x213   : > { %v1524_v38 = vpop.f32.mrb[2].mxu0  ;;  %v1536_v39 = vpop.f32.mrb[2].mxu1 }
 0x214   : > { %v1213_v16 = vadd.f32 %v1524_v38, %v1453_v1  ;;  %v1253_v40 = vadd.f32 %v1536_v39, %v1453_v1  ;;  %v1207_v50 = vpop.f32.mrb[3].mxu0  ;;  %v1247_v34 = vpop.f32.mrb[3].mxu1 }
 0x215   : > { %v1208_v55 = vadd.f32 %v1453_v1, %v1207_v50  ;;  %v1248_v37 = vadd.f32 %v1453_v1, %v1247_v34 }
 0x216   : > { %1280 = vst.msk [vmem:[%s2546_s16 + $0x18] sm:$0xff] %vm1276_vm14, %v1213_v16  ;;  %1288 = vst.msk [vmem:[%s2546_s16 + $0x58] sm:$0xff] %vm1276_vm14, %v1253_v40 }
 0x217   : > { %1279 = vst.msk [vmem:[%s2546_s16 + $0x10] sm:$0xff] %vm1276_vm14, %v1208_v55  ;;  %1287 = vst.msk [vmem:[%s2546_s16 + $0x50] sm:$0xff] %vm1276_vm14, %v1248_v37 }
 0x24f   : > { %v1539_v45 = vpop.f32.mrb[4].mxu1 }
 0x250   : > { %v1527_v52 = vpop.f32.mrb[4].mxu0  ;;  %v1263_v53 = vadd.f32 %v1539_v45, %v1453_v1  ;;  %v1257_v58 = vpop.f32.mrb[5].mxu1 }
 0x251   : > { %v1223_v59 = vadd.f32 %v1527_v52, %v1453_v1  ;;  %v1217_v5 = vpop.f32.mrb[5].mxu0  ;;  %v1258_v23 = vadd.f32 %v1453_v1, %v1257_v58 }
 0x252   : > { %1290 = vst.msk [vmem:[%s2546_s16 + $0x68] sm:$0xff] %vm1276_vm14, %v1263_v53  ;;  %v1218_v12 = vadd.f32 %v1453_v1, %v1217_v5 }
 0x253   : > { %1282 = vst.msk [vmem:[%s2546_s16 + $0x28] sm:$0xff] %vm1276_vm14, %v1223_v59  ;;  %1289 = vst.msk [vmem:[%s2546_s16 + $0x60] sm:$0xff] %vm1276_vm14, %v1258_v23 }
 0x254   : > { %1281 = vst.msk [vmem:[%s2546_s16 + $0x20] sm:$0xff] %vm1276_vm14, %v1218_v12 }
 0x26b   : > { %v1542_v25 = vpop.f32.mrb[6].mxu1 }
 0x26c   : > { %v1530_v13 = vpop.f32.mrb[6].mxu0  ;;  %v1273_v56 = vadd.f32 %v1542_v25, %v1453_v1  ;;  %v1267_v57 = vpop.f32.mrb[7].mxu1 }
 0x26d   : > { %v1233_v60 = vadd.f32 %v1530_v13, %v1453_v1  ;;  %v1227_v61 = vpop.f32.mrb[7].mxu0  ;;  %v1268_v24 = vadd.f32 %v1453_v1, %v1267_v57 }
 0x26e   : > { %1292 = vst.msk [vmem:[%s2546_s16 + $0x78] sm:$0xff] %vm1276_vm14, %v1273_v56  ;;  %v1228_v20 = vadd.f32 %v1453_v1, %v1227_v61 }
 0x26f   : > { %1284 = vst.msk [vmem:[%s2546_s16 + $0x38] sm:$0xff] %vm1276_vm14, %v1233_v60  ;;  %1291 = vst.msk [vmem:[%s2546_s16 + $0x70] sm:$0xff] %vm1276_vm14, %v1268_v24 }
 0x270   : > { %1283 = vst.msk [vmem:[%s2546_s16 + $0x30] sm:$0xff] %vm1276_vm14, %v1228_v20 }
 0x271   : > { %1656 = shalt.err (!%p1653_p10)
}
 0x272   : > { %s1657_s0 = scalar_lea.hbm %s2578_s21, 2048  ;;  %s1661_s17 = scalar_lea.hbm %s2649_s5, 8192 }
 0x273   : > { %p1658_p11 = scmp.ne.s32.totalorder %s2578_s21, %s1657_s0  ;;  %p1662_p0 = scmp.lt.u32.totalorder %s2578_s21, %s2649_s5 }
 0x274   : > { %p1663_p1 = scmp.lt.u32.totalorder %s1661_s17, %s1657_s0  ;;  %p1665_p4 = scmp.lt.u32.totalorder %s1657_s0, %s2578_s21 }
 0x275   : > { %p1659_p12 = pnand %p1658_p11, %p1832_p3 }
 0x276   : > { %p1664_p2 = por %p1663_p1, %p1662_p0 }
 0x277   : > { %p1660_p13 = pneg %p1659_p12 }
 0x278   : > { %p1666_p5 = por %p1665_p4, %p1664_p2 }
 0x27a   : > { %p1667_p6 = pnand %p1666_p5, %p1660_p13 }
 0x27c   : > { %1670 = shalt.err (!%p1667_p6)
}
 0x27d   : > { %s1749_s15 = smov 128   ;;  %s1750_s13 = smov 8  }
 0x27e   : > { %1561 = dma.vmem_to_hbm [thread:$0]  (%p1832_p3), %s2580_s8, 2048, %s2578_s21, %s2592_s22, %s1749_s15, %s1749_s15, %s1750_s13  }
 0x27f PF: > { %p1567_p7 = scmp.ge.s32.totalorder %s1737_s25, 2  ;;  %s1325_s12 = sand.u32 1, %s1709_s18  }
 0x280   : > { %s1326_s27 = scalar_lea.sflag [#allocation3], %s1325_s12 }
 0x281   : > { %p1564_p9 = pnand %p1567_p7, %p1841_p8 }
 0x283   : > { %1704 = dma.done.wait (!%p1564_p9), %s1326_s27, 2048  }
 0x284   : > { %1706 = vsyncadd (!%p1564_p9), %s1326_s27, 4294965248  ;;  %s18_s25 = sadd.s32 1, %s1737_s25   ;;  %s2703_s18 = smov %s1713_s19 }
 0x285   : > { %p15_p10 = scmp.ge.s32.totalorder %s18_s25, 6   ;;  %s2704_s19 = smov %s1717_s20 }
 0x286   : > { %s2705_s20 = smov %s1850_s11  ;;  %s2706_s21 = smov %s1729_s23 }
 0x287   : > { %s2707_s22 = smov %s1733_s24  ;;  %s2708_s23 = smov %s2711_s28 }
 0x288   : > { %s2709_s24 = smov %s2715_s29  ;;  %17 = sbr.rel (!%p15_p10) target bundleno = 7 (0x7), region = 81 }
 0x28f   :  { %1331 = vsyncpa [#allocation3], 1 }
 0x290   :  { %1333 = vsyncpa [#allocation3 + $0x1], 1 }

</bundles_post_ra>
